<compile_context>
chip_gen: v7x
topology: tpu7x:2x2x1
jax: 0.10.0
libtpu: 0.0.40
codegen_flags: <defaults>
</compile_context>

<pallas_src>
import jax
import jax.numpy as jnp
import numpy as np
from jax.experimental import pallas as pl
from jax.experimental.pallas import tpu as pltpu


def _round_up(v, m):
    return ((v + m - 1) // m) * m


def _default_compute_dtype():
    """bf16 MXU operands on v6e/v7x (with f32 accumulation), f32 elsewhere."""
    try:
        kind = jax.devices()[0].device_kind.lower()
    except Exception:
        return jnp.float32
    return jnp.bfloat16 if ("v6" in kind or "v7" in kind) else jnp.float32


def _vmem_limit_bytes():
    """~75% of physical VMEM: ~96 MiB on v5e/v6e (128 MiB), 48 MiB on v7x."""
    cap = 64 * 1024 * 1024
    try:
        cap = int(pltpu.get_tpu_info().vmem_capacity_bytes)
    except Exception:
        pass
    return min((cap * 3) // 4, 100 * 1024 * 1024)


def _resident_spec(shape, use_buffered):
    """BlockSpec for a weight that stays resident across all grid steps."""
    index_map = lambda *_: (0,) * len(shape)
    if use_buffered:
        # Constant block index -> single-buffer it (halves resident VMEM).
        return pl.BlockSpec(tuple(shape), index_map,
                            pipeline_mode=pl.Buffered(1))
    return pl.BlockSpec(tuple(shape), index_map)


def _try_buffered(fn):
    """Run fn(use_buffered=True); if pl.Buffered(1) residency is rejected by
    this Pallas/Mosaic version, fall back to default double-buffering."""
    try:
        return fn(True)
    except Exception:
        return fn(False)


# ---------------------------------------------------------------------------
# Kernels
# ---------------------------------------------------------------------------
def _make_edge_kernel(compute_dtype):
    """edge = (rbf @ W_rbf) * x for one edge tile.  Used only when the scatter
    falls back to node tiling, so the matmul is never recomputed per tile."""
    def kernel(rbf_ref, x_ref, w_rbf_ref, edge_ref):
        e = jnp.dot(rbf_ref[...], w_rbf_ref[...],
                    preferred_element_type=jnp.float32)
        edge_ref[...] = (e * x_ref[...].astype(jnp.float32)).astype(
            edge_ref.dtype)
    return kernel


def _scatter_accumulate(idx_ref, edge, acc_ref, compute_dtype):
    """acc[n, :] += sum_{e in tile : idx[e] == n} edge[e, :] via one-hot MXU."""
    tile_n = acc_ref.shape[0]
    node_ids = (pl.program_id(0) * tile_n
                + jax.lax.broadcasted_iota(jnp.int32, (tile_n, 1), 0))
    onehot = jnp.where(node_ids == idx_ref[...],
                       jnp.array(1, compute_dtype),
                       jnp.array(0, compute_dtype))
    acc_ref[...] += jnp.dot(onehot, edge, preferred_element_type=jnp.float32)


def _make_scatter_fused_kernel(compute_dtype, num_edges, tile_e):
    """Single pass over edges: edge features computed in place and accumulated
    into the resident (node, hidden) f32 scratch; flushed at the last tile."""
    def kernel(idx_ref, rbf_ref, x_ref, w_rbf_ref, out_ref, acc_ref):
        k = pl.program_id(1)

        @pl.when(k == 0)
        def _init():
            acc_ref[...] = jnp.zeros_like(acc_ref)

        # Mask the partial/OOB tail of the last edge tile (kills garbage,
        # incl. NaN/Inf, from unpadded inputs).
        rows = k * tile_e + jax.lax.broadcasted_iota(jnp.int32, (tile_e, 1), 0)
        valid = rows < num_edges

        edge = jnp.dot(rbf_ref[...], w_rbf_ref[...],
                       preferred_element_type=jnp.float32)
        edge = edge * x_ref[...].astype(jnp.float32)
        edge = jnp.where(valid, edge, 0.0).astype(compute_dtype)

        _scatter_accumulate(idx_ref, edge, acc_ref, compute_dtype)

        @pl.when(k == pl.num_programs(1) - 1)
        def _flush():
            out_ref[...] = acc_ref[...].astype(out_ref.dtype)
    return kernel


def _make_scatter_edge_kernel(compute_dtype, num_edges, tile_e):
    """Node-tiled fallback: consumes precomputed edge features only."""
    def kernel(idx_ref, edge_ref, out_ref, acc_ref):
        k = pl.program_id(1)

        @pl.when(k == 0)
        def _init():
            acc_ref[...] = jnp.zeros_like(acc_ref)

        rows = k * tile_e + jax.lax.broadcasted_iota(jnp.int32, (tile_e, 1), 0)
        valid = rows < num_edges
        edge = jnp.where(valid, edge_ref[...], jnp.zeros((), edge_ref.dtype))
        _scatter_accumulate(idx_ref, edge.astype(compute_dtype), acc_ref,
                            compute_dtype)

        @pl.when(k == pl.num_programs(1) - 1)
        def _flush():
            out_ref[...] = acc_ref[...].astype(out_ref.dtype)
    return kernel


def _make_heads_kernel(num_heads, num_layers, compute_dtype):
    """All output heads fused: up-proj, num_layers x SiLU(Linear), and the
    final projections accumulated into one shared 128-aligned output slab."""
    per_head = 1 + 2 * num_layers  # w_up, (w, b) * num_layers
    n_w = num_heads * per_head

    def kernel(xspe_ref, *refs):
        head_w = refs[:n_w]
        out_slabs = refs[n_w:n_w + num_heads]
        out_ref = refs[n_w + num_heads]

        xs = xspe_ref[...].astype(compute_dtype)
        out = None
        for a in range(num_heads):
            base = a * per_head
            h = jnp.dot(xs, head_w[base][...],
                        preferred_element_type=jnp.float32)
            for l in range(num_layers):
                w = head_w[base + 1 + 2 * l][...]
                b = head_w[base + 2 + 2 * l][...]
                h = jnp.dot(h.astype(compute_dtype), w,
                            preferred_element_type=jnp.float32)
                h = h + b.astype(jnp.float32)
                h = h * jax.nn.sigmoid(h)        # SiLU / swish (DimeNet act)
            # Zero-embedded (block-diagonal) final weight -> contributions of
            # different heads land in disjoint columns of the shared slab.
            part = jnp.dot(h.astype(compute_dtype), out_slabs[a][...],
                           preferred_element_type=jnp.float32)
            out = part if out is None else out + part
        out_ref[...] = out
    return kernel


# ---------------------------------------------------------------------------
# Host-side weight preparation (cacheable across calls)
# ---------------------------------------------------------------------------
def prepare_params(params, compute_dtype):
    """One-time cast / pack of module weights for the Pallas path."""
    cd = compute_dtype
    num_heads = len(params["w_ups"])
    num_layers = len(params["layers"][0])
    out_emb = int(params["w_ups"][0].shape[1])
    c_list = [int(w.shape[1]) for w in params["w_outs"]]
    col_off = [int(v) for v in np.cumsum([0] + c_list[:-1])]
    c_total_pad = _round_up(max(sum(c_list), 1), 128)

    head_weights = []
    for a in range(num_heads):
        head_weights.append(jnp.asarray(params["w_ups"][a], cd))
        for (w, b) in params["layers"][a]:
            head_weights.append(jnp.asarray(w, cd))
            head_weights.append(jnp.asarray(b, jnp.float32).reshape(1, -1))

    # Per-head final weight embedded into one shared lane-aligned slab.
    w_out_slabs = []
    for a in range(num_heads):
        slab = jnp.zeros((out_emb, c_total_pad), cd)
        slab = slab.at[:, col_off[a]:col_off[a] + c_list[a]].set(
            jnp.asarray(params["w_outs"][a], cd))
        w_out_slabs.append(slab)

    return dict(compute_dtype=cd,
                w_rbf=jnp.asarray(params["w_rbf"], cd),
                head_weights=head_weights,
                w_out_slabs=w_out_slabs,
                num_heads=num_heads, num_layers=num_layers,
                out_emb=out_emb, c_list=c_list, col_off=col_off,
                c_total_pad=c_total_pad)


# ---------------------------------------------------------------------------
# Wrapper
# ---------------------------------------------------------------------------
def output_pp_block_swm(x, rbf, i, params, num_nodes, *,
                        compute_dtype=None, prepared=None,
                        tile_e=2048, tile_n_heads=512,
                        scatter_node_tile=512,
                        node_acc_budget_bytes=24 * 1024 * 1024):
    """Pallas implementation of OutputPPBlockSWM.forward with bt=None."""
    if compute_dtype is None:
        compute_dtype = (prepared["compute_dtype"] if prepared is not None
                         else _default_compute_dtype())
    cd = compute_dtype
    if prepared is None or prepared["compute_dtype"] != cd:
        prepared = prepare_params(params, cd)

    E, H = x.shape
    R = rbf.shape[1]
    num_heads = prepared["num_heads"]
    num_layers = prepared["num_layers"]
    c_total_pad = prepared["c_total_pad"]
    w_rbf = prepared["w_rbf"]
    head_weights = prepared["head_weights"]
    w_out_slabs = prepared["w_out_slabs"]

    vmem_limit = _vmem_limit_bytes()
    cp_scatter = pltpu.CompilerParams(
        dimension_semantics=("parallel", "arbitrary"),
        vmem_limit_bytes=vmem_limit)
    cp_map = pltpu.CompilerParams(
        dimension_semantics=("parallel",),
        vmem_limit_bytes=vmem_limit)

    # --- edge tiling: no physical pad/copy of x/rbf when E >= tile_e; the
    #     partial last block is masked in-kernel against the static E. --------
    assert tile_e % 128 == 0, "edge tile must be a multiple of 128"
    if E >= tile_e:
        tE = tile_e
        n_etiles = pl.cdiv(E, tE)
        x_in = x.astype(cd)
        rbf_in = rbf.astype(cd)
        idx_in = i.astype(jnp.int32).reshape(1, E)
    else:
        # Small problem: a single lane-aligned padded edge block is cheap.
        tE = _round_up(max(E, 1), 128)
        n_etiles = 1
        x_in = jnp.zeros((tE, H), cd).at[:E].set(x.astype(cd))
        rbf_in = jnp.zeros((tE, R), cd).at[:E].set(rbf.astype(cd))
        idx_in = jnp.full((1, tE), -1, jnp.int32).at[0, :E].set(
            i.astype(jnp.int32))

    # --- node tiling: keep the whole accumulator resident in VMEM whenever it
    #     fits -> edges are streamed exactly once. -----------------------------
    N8 = _round_up(max(num_nodes, 1), 8)
    if N8 * H * 4 <= node_acc_budget_bytes:
        tN = N8
    else:
        assert scatter_node_tile % 8 == 0, "node tile must be a multiple of 8"
        tN = min(scatter_node_tile, N8)
    N_pad = _round_up(N8, tN)
    n_ntiles = N_pad // tN

    acc_scratch = [pltpu.VMEM((tN, H), jnp.float32)]
    out_spec_scatter = pl.BlockSpec((tN, H), lambda n, k: (n, 0))
    idx_spec = pl.BlockSpec((1, tE), lambda n, k: (0, k))

    if n_ntiles == 1:
        # Single pass over edges; rbf @ W_rbf fused into the scatter.
        def run_scatter(use_buffered):
            return pl.pallas_call(
                _make_scatter_fused_kernel(cd, E, tE),
                out_shape=jax.ShapeDtypeStruct((N_pad, H), cd),
                grid=(1, n_etiles),
                in_specs=[idx_spec,
                          pl.BlockSpec((tE, R), lambda n, k: (k, 0)),
                          pl.BlockSpec((tE, H), lambda n, k: (k, 0)),
                          _resident_spec(w_rbf.shape, use_buffered)],
                out_specs=out_spec_scatter,
                scratch_shapes=acc_scratch,
                compiler_params=cp_scatter,
            )(idx_in, rbf_in, x_in, w_rbf)
        x_spe = _try_buffered(run_scatter)
    else:
        # Node-tiled fallback (huge graphs): hoist the edge features so only
        # `edge` is re-streamed per node tile (no rbf re-read / recompute).
        def run_edge(use_buffered):
            return pl.pallas_call(
                _make_edge_kernel(cd),
                out_shape=jax.ShapeDtypeStruct((x_in.shape[0], H), cd),
                grid=(n_etiles,),
                in_specs=[pl.BlockSpec((tE, R), lambda k: (k, 0)),
                          pl.BlockSpec((tE, H), lambda k: (k, 0)),
                          _resident_spec(w_rbf.shape, use_buffered)],
                out_specs=pl.BlockSpec((tE, H), lambda k: (k, 0)),
                compiler_params=cp_map,
            )(rbf_in, x_in, w_rbf)
        edge = _try_buffered(run_edge)

        x_spe = pl.pallas_call(
            _make_scatter_edge_kernel(cd, E, tE),
            out_shape=jax.ShapeDtypeStruct((N_pad, H), cd),
            grid=(n_ntiles, n_etiles),
            in_specs=[idx_spec,
                      pl.BlockSpec((tE, H), lambda n, k: (k, 0))],
            out_specs=out_spec_scatter,
            scratch_shapes=acc_scratch,
            compiler_params=cp_scatter,
        )(idx_in, edge)

    # --- fused output heads ---------------------------------------------------
    assert tile_n_heads % 8 == 0, "heads node tile must be a multiple of 8"
    tNh = N_pad if N_pad <= tile_n_heads else tile_n_heads
    n_htiles = pl.cdiv(N_pad, tNh)

    def run_heads(use_buffered):
        in_specs = [pl.BlockSpec((tNh, H), lambda n: (n, 0))]
        for w in list(head_weights) + list(w_out_slabs):
            in_specs.append(_resident_spec(w.shape, use_buffered))
        return pl.pallas_call(
            _make_heads_kernel(num_heads, num_layers, cd),
            out_shape=jax.ShapeDtypeStruct((N_pad, c_total_pad), jnp.float32),
            grid=(n_htiles,),
            in_specs=in_specs,
            out_specs=pl.BlockSpec((tNh, c_total_pad), lambda n: (n, 0)),
            compiler_params=cp_map,
        )(x_spe, *head_weights, *w_out_slabs)

    big = _try_buffered(run_heads)

    return [big[:num_nodes, off:off + c]
            for off, c in zip(prepared["col_off"], prepared["c_list"])]


# ---------------------------------------------------------------------------
# Parameters + pure-JAX reference
# ---------------------------------------------------------------------------
def init_params(key, num_radial, hidden, out_emb, out_channels, num_layers,
                num_aux, aux_output_channels=None):
    """Deterministic synthetic init.

    NOTE: reset_parameters() in the reference zeroes the final `lins` weights
    (which would make the forward output trivially zero); here all no-bias
    Linears get deterministic scaled-normal weights so the kernel path is
    actually exercised. Hidden-layer biases are zero, matching the reference.
    """
    if aux_output_channels is None:
        aux_output_channels = [out_channels] * num_aux
    aux_output_channels = [out_channels] + list(aux_output_channels)

    ks = iter(jax.random.split(key, 128))

    def lin(in_f, out_f):
        return (jax.random.normal(next(ks), (in_f, out_f), jnp.float32)
                * (1.0 / np.sqrt(in_f)))

    params = {}
    params["w_rbf"] = lin(num_radial, hidden)
    params["w_ups"] = [lin(hidden, out_emb) for _ in range(num_aux + 1)]
    params["layers"] = [
        [(lin(out_emb, out_emb), jnp.zeros((1, out_emb), jnp.float32))
         for _ in range(num_layers)]
        for _ in range(num_aux + 1)
    ]
    params["w_outs"] = [lin(out_emb, c) for c in aux_output_channels]
    return params


def reference(x, rbf, i, params, num_nodes):
    """Pure-JAX reference of the same forward (bt=None)."""
    edge = (rbf @ params["w_rbf"]) * x
    x_spe = jax.ops.segment_sum(edge, i, num_segments=num_nodes)
    outs = []
    for a in range(len(params["w_ups"])):
        h = x_spe @ params["w_ups"][a]
        for (w, b) in params["layers"][a]:
            h = jax.nn.silu(h @ w + b)
        outs.append(h @ params["w_outs"][a])
    return outs


if __name__ == "__main__":
    # Small shapes consistent with the module: E edges scattered onto N nodes.
    num_radial, hidden, out_emb, out_ch = 8, 32, 64, 8
    num_layers, num_aux = 2, 1
    E, N = 300, 40

    key = jax.random.PRNGKey(0)
    k1, k2, k3, k4 = jax.random.split(key, 4)
    x = jax.random.normal(k1, (E, hidden), jnp.float32)
    rbf = jax.random.normal(k2, (E, num_radial), jnp.float32)
    i = jax.random.randint(k3, (E,), 0, N, dtype=jnp.int32)
    params = init_params(k4, num_radial, hidden, out_emb, out_ch,
                         num_layers, num_aux, aux_output_channels=[10])

    refs = reference(x, rbf, i, params, N)

    # 1) f32, single-pass scatter (resident node accumulator), multi-tile edge
    #    reduction with an unpadded partial tail (tile_e=128 over E=300).
    prepared_f32 = prepare_params(params, jnp.float32)
    outs = output_pp_block_swm(x, rbf, i, params, N,
                               compute_dtype=jnp.float32,
                               prepared=prepared_f32, tile_e=128)
    outs = jax.block_until_ready(outs)
    for o, r in zip(outs, refs):
        np.testing.assert_allclose(np.asarray(o), np.asarray(r),
                                   rtol=2e-4, atol=2e-4)

    # 2) f32, forced node-tiled fallback: hoisted edge precompute kernel +
    #    (node, edge) scatter grid.
    outs_fb = output_pp_block_swm(x, rbf, i, params, N,
                                  compute_dtype=jnp.float32,
                                  prepared=prepared_f32, tile_e=128,
                                  scatter_node_tile=16,
                                  node_acc_budget_bytes=0)
    outs_fb = jax.block_until_ready(outs_fb)
    for o, r in zip(outs_fb, refs):
        np.testing.assert_allclose(np.asarray(o), np.asarray(r),
                                   rtol=2e-4, atol=2e-4)

    # 3) bf16 MXU-operand fast path (default on v6e/v7x), f32 accumulation.
    outs_bf16 = output_pp_block_swm(x, rbf, i, params, N,
                                    compute_dtype=jnp.bfloat16, tile_e=128)
    outs_bf16 = jax.block_until_ready(outs_bf16)
    for o, r in zip(outs_bf16, refs):
        np.testing.assert_allclose(np.asarray(o, dtype=np.float32),
                                   np.asarray(r), rtol=1e-1, atol=1e-1)

    print("KERNEL_OK")
</pallas_src>

<mosaic_0001>
module attributes {stable_mosaic.version = 11 : i64} {
  func.func @kernel(%arg0: i32, %arg1: i32, %arg2: memref<1x128xi32, #tpu.memory_space<vmem>>, %arg3: memref<128x8xf32, #tpu.memory_space<vmem>>, %arg4: memref<128x32xf32, #tpu.memory_space<vmem>>, %arg5: memref<8x32xf32, #tpu.memory_space<vmem>>, %arg6: memref<40x32xf32, #tpu.memory_space<vmem>>, %arg7: memref<40x32xf32, #tpu.memory_space<vmem>>) attributes {dimension_semantics = [#tpu.dimension_semantics<parallel>, #tpu.dimension_semantics<arbitrary>], iteration_bounds = array<i64: 1, 3>, scalar_prefetch = 0 : i64, scratch_operands = 1 : i64, tpu.core_type = #tpu.core_type<tc>, window_params = [{transform_indices = @transform_0, window_bounds = array<i64: 1, 128>}, {transform_indices = @transform_1, window_bounds = array<i64: 128, 8>}, {transform_indices = @transform_2, window_bounds = array<i64: 128, 32>}, {pipeline_mode = #tpu.pipeline_mode<synchronous>, transform_indices = @transform_3, window_bounds = array<i64: 8, 32>}, {transform_indices = @transform_4, window_bounds = array<i64: 40, 32>}]} {
    %c0_i32 = arith.constant 0 : i32
    %0 = arith.cmpi eq, %arg1, %c0_i32 : i32
    %1 = arith.extui %0 : i1 to i32
    %c0_i32_0 = arith.constant 0 : i32
    %2 = arith.cmpi ne, %1, %c0_i32_0 : i32
    scf.if %2 {
      %cst_17 = arith.constant 0.000000e+00 : f32
      %36 = vector.broadcast %cst_17 : f32 to vector<40x32xf32>
      %c0_18 = arith.constant 0 : index
      %c0_19 = arith.constant 0 : index
      %37 = vector.load %arg7[%c0_18, %c0_19] : memref<40x32xf32, #tpu.memory_space<vmem>>, vector<40x32xf32>
      tpu.vector_store %arg7[%c0_18, %c0_19], %36 {strides = array<i32>} : memref<40x32xf32, #tpu.memory_space<vmem>>, vector<40x32xf32>,
    } else {
    }
    %c128_i32 = arith.constant 128 : i32
    %3 = arith.muli %arg1, %c128_i32 : i32
    %4 = tpu.iota {dimensions = array<i32: 0>} : vector<128x1xi32>
    %5 = vector.broadcast %3 : i32 to vector<128x1xi32>
    %6 = arith.addi %5, %4 : vector<128x1xi32>
    %c300_i32 = arith.constant 300 : i32
    %7 = vector.broadcast %c300_i32 : i32 to vector<128x1xi32>
    %8 = arith.cmpi slt, %6, %7 : vector<128x1xi32>
    %c0 = arith.constant 0 : index
    %c0_1 = arith.constant 0 : index
    %9 = vector.load %arg3[%c0, %c0_1] : memref<128x8xf32, #tpu.memory_space<vmem>>, vector<128x8xf32>
    %c0_2 = arith.constant 0 : index
    %c0_3 = arith.constant 0 : index
    %10 = vector.load %arg5[%c0_2, %c0_3] : memref<8x32xf32, #tpu.memory_space<vmem>>, vector<8x32xf32>
    %cst = arith.constant dense<0.000000e+00> : vector<128x32xf32>
    %11 = tpu.matmul %9, %10, %cst {dimension_numbers = #tpu.dot_dimension_numbers<[1], [0], [0], [1], [0, 0, 1, 1], [], []>} : vector<128x8xf32>, vector<8x32xf32>, vector<128x32xf32> -> vector<128x32xf32>
    %c0_4 = arith.constant 0 : index
    %c0_5 = arith.constant 0 : index
    %12 = vector.load %arg4[%c0_4, %c0_5] : memref<128x32xf32, #tpu.memory_space<vmem>>, vector<128x32xf32>
    %13 = arith.mulf %11, %12 : vector<128x32xf32>
    %cst_6 = arith.constant 0.000000e+00 : f32
    %14 = vector.shape_cast %8 : vector<128x1xi1> to vector<128x1xi1>
    %15 = vector.broadcast %14 : vector<128x1xi1> to vector<128x32xi1>
    %16 = vector.broadcast %cst_6 : f32 to vector<128x32xf32>
    %17 = arith.select %15, %13, %16 : vector<128x32xi1>, vector<128x32xf32>
    %c40_i32 = arith.constant 40 : i32
    %18 = arith.muli %arg0, %c40_i32 : i32
    %19 = tpu.iota {dimensions = array<i32: 0>} : vector<40x1xi32>
    %20 = vector.broadcast %18 : i32 to vector<40x1xi32>
    %21 = arith.addi %20, %19 : vector<40x1xi32>
    %c0_7 = arith.constant 0 : index
    %c0_8 = arith.constant 0 : index
    %22 = vector.load %arg2[%c0_7, %c0_8] : memref<1x128xi32, #tpu.memory_space<vmem>>, vector<1x128xi32>
    %23 = vector.broadcast %21 : vector<40x1xi32> to vector<40x128xi32>
    %24 = vector.broadcast %22 : vector<1x128xi32> to vector<40x128xi32>
    %25 = arith.cmpi eq, %23, %24 : vector<40x128xi32>
    %cst_9 = arith.constant 1.000000e+00 : f32
    %cst_10 = arith.constant 0.000000e+00 : f32
    %26 = vector.broadcast %cst_9 : f32 to vector<40x128xf32>
    %27 = vector.broadcast %cst_10 : f32 to vector<40x128xf32>
    %28 = arith.select %25, %26, %27 : vector<40x128xi1>, vector<40x128xf32>
    %c0_11 = arith.constant 0 : index
    %c0_12 = arith.constant 0 : index
    %29 = vector.load %arg7[%c0_11, %c0_12] : memref<40x32xf32, #tpu.memory_space<vmem>>, vector<40x32xf32>
    %cst_13 = arith.constant dense<0.000000e+00> : vector<40x32xf32>
    %30 = tpu.matmul %28, %17, %cst_13 {dimension_numbers = #tpu.dot_dimension_numbers<[1], [0], [0], [1], [0, 0, 1, 1], [], []>} : vector<40x128xf32>, vector<128x32xf32>, vector<40x32xf32> -> vector<40x32xf32>
    %31 = arith.addf %29, %30 : vector<40x32xf32>
    %c0_14 = arith.constant 0 : index
    %c0_15 = arith.constant 0 : index
    %32 = vector.load %arg7[%c0_14, %c0_15] : memref<40x32xf32, #tpu.memory_space<vmem>>, vector<40x32xf32>
    tpu.vector_store %arg7[%c0_14, %c0_15], %31 {strides = array<i32>} : memref<40x32xf32, #tpu.memory_space<vmem>>, vector<40x32xf32>,
    %c2_i32 = arith.constant 2 : i32
    %33 = arith.cmpi eq, %arg1, %c2_i32 : i32
    %34 = arith.extui %33 : i1 to i32
    %c0_i32_16 = arith.constant 0 : i32
    %35 = arith.cmpi ne, %34, %c0_i32_16 : i32
    scf.if %35 {
      %c0_17 = arith.constant 0 : index
      %c0_18 = arith.constant 0 : index
      %36 = vector.load %arg7[%c0_17, %c0_18] : memref<40x32xf32, #tpu.memory_space<vmem>>, vector<40x32xf32>
      %c0_19 = arith.constant 0 : index
      %c0_20 = arith.constant 0 : index
      %37 = vector.load %arg6[%c0_19, %c0_20] : memref<40x32xf32, #tpu.memory_space<vmem>>, vector<40x32xf32>
      tpu.vector_store %arg6[%c0_19, %c0_20], %36 {strides = array<i32>} : memref<40x32xf32, #tpu.memory_space<vmem>>, vector<40x32xf32>,
    } else {
    }
    return
  }
  func.func @transform_0(%arg0: i32, %arg1: i32) -> (i32, i32) {
    %c0_i32 = arith.constant 0 : i32
    %c0_i32_0 = arith.constant 0 : i32
    return %c0_i32, %arg1 : i32, i32
  }
  func.func @transform_1(%arg0: i32, %arg1: i32) -> (i32, i32) {
    %c0_i32 = arith.constant 0 : i32
    %c0_i32_0 = arith.constant 0 : i32
    return %arg1, %c0_i32 : i32, i32
  }
  func.func @transform_2(%arg0: i32, %arg1: i32) -> (i32, i32) {
    %c0_i32 = arith.constant 0 : i32
    %c0_i32_0 = arith.constant 0 : i32
    return %arg1, %c0_i32 : i32, i32
  }
  func.func @transform_3(%arg0: i32, %arg1: i32) -> (i32, i32) {
    %c0_i32 = arith.constant 0 : i32
    %c0_i32_0 = arith.constant 0 : i32
    %c0_i32_1 = arith.constant 0 : i32
    return %c0_i32, %c0_i32_0 : i32, i32
  }
  func.func @transform_4(%arg0: i32, %arg1: i32) -> (i32, i32) {
    %c0_i32 = arith.constant 0 : i32
    %c0_i32_0 = arith.constant 0 : i32
    return %arg0, %c0_i32 : i32, i32
  }
}

module attributes {stable_mosaic.version = 11 : i64} {
  func.func @kernel(%arg0: i32, %arg1: i32, %arg2: memref<1x128xi32, #tpu.memory_space<vmem>>, %arg3: memref<128x8xf32, #tpu.memory_space<vmem>>, %arg4: memref<128x32xf32, #tpu.memory_space<vmem>>, %arg5: memref<8x32xf32, #tpu.memory_space<vmem>>, %arg6: memref<40x32xf32, #tpu.memory_space<vmem>>, %arg7: memref<40x32xf32, #tpu.memory_space<vmem>>) attributes {dimension_semantics = [#tpu.dimension_semantics<parallel>, #tpu.dimension_semantics<arbitrary>], iteration_bounds = array<i64: 1, 3>, scalar_prefetch = 0 : i64, scratch_operands = 1 : i64, tpu.core_type = #tpu.core_type<tc>, window_params = [{transform_indices = @transform_0, window_bounds = array<i64: 1, 128>}, {transform_indices = @transform_1, window_bounds = array<i64: 128, 8>}, {transform_indices = @transform_2, window_bounds = array<i64: 128, 32>}, {pipeline_mode = #tpu.pipeline_mode<synchronous>, transform_indices = @transform_3, window_bounds = array<i64: 8, 32>}, {transform_indices = @transform_4, window_bounds = array<i64: 40, 32>}]} {
    %c0_i32 = arith.constant 0 : i32
    %0 = arith.cmpi eq, %arg1, %c0_i32 : i32
    %1 = arith.extui %0 : i1 to i32
    %c0_i32_0 = arith.constant 0 : i32
    %2 = arith.cmpi ne, %1, %c0_i32_0 : i32
    scf.if %2 {
      %cst_17 = arith.constant 0.000000e+00 : f32
      %36 = vector.broadcast %cst_17 : f32 to vector<40x32xf32>
      %c0_18 = arith.constant 0 : index
      %c0_19 = arith.constant 0 : index
      %37 = vector.load %arg7[%c0_18, %c0_19] : memref<40x32xf32, #tpu.memory_space<vmem>>, vector<40x32xf32>
      tpu.vector_store %arg7[%c0_18, %c0_19], %36 {strides = array<i32>} : memref<40x32xf32, #tpu.memory_space<vmem>>, vector<40x32xf32>,
    } else {
    }
    %c128_i32 = arith.constant 128 : i32
    %3 = arith.muli %arg1, %c128_i32 : i32
    %4 = tpu.iota {dimensions = array<i32: 0>} : vector<128x1xi32>
    %5 = vector.broadcast %3 : i32 to vector<128x1xi32>
    %6 = arith.addi %5, %4 : vector<128x1xi32>
    %c300_i32 = arith.constant 300 : i32
    %7 = vector.broadcast %c300_i32 : i32 to vector<128x1xi32>
    %8 = arith.cmpi slt, %6, %7 : vector<128x1xi32>
    %c0 = arith.constant 0 : index
    %c0_1 = arith.constant 0 : index
    %9 = vector.load %arg3[%c0, %c0_1] : memref<128x8xf32, #tpu.memory_space<vmem>>, vector<128x8xf32>
    %c0_2 = arith.constant 0 : index
    %c0_3 = arith.constant 0 : index
    %10 = vector.load %arg5[%c0_2, %c0_3] : memref<8x32xf32, #tpu.memory_space<vmem>>, vector<8x32xf32>
    %cst = arith.constant dense<0.000000e+00> : vector<128x32xf32>
    %11 = tpu.matmul %9, %10, %cst {dimension_numbers = #tpu.dot_dimension_numbers<[1], [0], [0], [1], [0, 0, 1, 1], [], []>} : vector<128x8xf32>, vector<8x32xf32>, vector<128x32xf32> -> vector<128x32xf32>
    %c0_4 = arith.constant 0 : index
    %c0_5 = arith.constant 0 : index
    %12 = vector.load %arg4[%c0_4, %c0_5] : memref<128x32xf32, #tpu.memory_space<vmem>>, vector<128x32xf32>
    %13 = arith.mulf %11, %12 : vector<128x32xf32>
    %cst_6 = arith.constant 0.000000e+00 : f32
    %14 = vector.shape_cast %8 : vector<128x1xi1> to vector<128x1xi1>
    %15 = vector.broadcast %14 : vector<128x1xi1> to vector<128x32xi1>
    %16 = vector.broadcast %cst_6 : f32 to vector<128x32xf32>
    %17 = arith.select %15, %13, %16 : vector<128x32xi1>, vector<128x32xf32>
    %c40_i32 = arith.constant 40 : i32
    %18 = arith.muli %arg0, %c40_i32 : i32
    %19 = tpu.iota {dimensions = array<i32: 0>} : vector<40x1xi32>
    %20 = vector.broadcast %18 : i32 to vector<40x1xi32>
    %21 = arith.addi %20, %19 : vector<40x1xi32>
    %c0_7 = arith.constant 0 : index
    %c0_8 = arith.constant 0 : index
    %22 = vector.load %arg2[%c0_7, %c0_8] : memref<1x128xi32, #tpu.memory_space<vmem>>, vector<1x128xi32>
    %23 = vector.broadcast %21 : vector<40x1xi32> to vector<40x128xi32>
    %24 = vector.broadcast %22 : vector<1x128xi32> to vector<40x128xi32>
    %25 = arith.cmpi eq, %23, %24 : vector<40x128xi32>
    %cst_9 = arith.constant 1.000000e+00 : f32
    %cst_10 = arith.constant 0.000000e+00 : f32
    %26 = vector.broadcast %cst_9 : f32 to vector<40x128xf32>
    %27 = vector.broadcast %cst_10 : f32 to vector<40x128xf32>
    %28 = arith.select %25, %26, %27 : vector<40x128xi1>, vector<40x128xf32>
    %c0_11 = arith.constant 0 : index
    %c0_12 = arith.constant 0 : index
    %29 = vector.load %arg7[%c0_11, %c0_12] : memref<40x32xf32, #tpu.memory_space<vmem>>, vector<40x32xf32>
    %cst_13 = arith.constant dense<0.000000e+00> : vector<40x32xf32>
    %30 = tpu.matmul %28, %17, %cst_13 {dimension_numbers = #tpu.dot_dimension_numbers<[1], [0], [0], [1], [0, 0, 1, 1], [], []>} : vector<40x128xf32>, vector<128x32xf32>, vector<40x32xf32> -> vector<40x32xf32>
    %31 = arith.addf %29, %30 : vector<40x32xf32>
    %c0_14 = arith.constant 0 : index
    %c0_15 = arith.constant 0 : index
    %32 = vector.load %arg7[%c0_14, %c0_15] : memref<40x32xf32, #tpu.memory_space<vmem>>, vector<40x32xf32>
    tpu.vector_store %arg7[%c0_14, %c0_15], %31 {strides = array<i32>} : memref<40x32xf32, #tpu.memory_space<vmem>>, vector<40x32xf32>,
    %c2_i32 = arith.constant 2 : i32
    %33 = arith.cmpi eq, %arg1, %c2_i32 : i32
    %34 = arith.extui %33 : i1 to i32
    %c0_i32_16 = arith.constant 0 : i32
    %35 = arith.cmpi ne, %34, %c0_i32_16 : i32
    scf.if %35 {
      %c0_17 = arith.constant 0 : index
      %c0_18 = arith.constant 0 : index
      %36 = vector.load %arg7[%c0_17, %c0_18] : memref<40x32xf32, #tpu.memory_space<vmem>>, vector<40x32xf32>
      %c0_19 = arith.constant 0 : index
      %c0_20 = arith.constant 0 : index
      %37 = vector.load %arg6[%c0_19, %c0_20] : memref<40x32xf32, #tpu.memory_space<vmem>>, vector<40x32xf32>
      tpu.vector_store %arg6[%c0_19, %c0_20], %36 {strides = array<i32>} : memref<40x32xf32, #tpu.memory_space<vmem>>, vector<40x32xf32>,
    } else {
    }
    return
  }
  func.func @transform_0(%arg0: i32, %arg1: i32) -> (i32, i32) {
    %c0_i32 = arith.constant 0 : i32
    %c0_i32_0 = arith.constant 0 : i32
    return %c0_i32, %arg1 : i32, i32
  }
  func.func @transform_1(%arg0: i32, %arg1: i32) -> (i32, i32) {
    %c0_i32 = arith.constant 0 : i32
    %c0_i32_0 = arith.constant 0 : i32
    return %arg1, %c0_i32 : i32, i32
  }
  func.func @transform_2(%arg0: i32, %arg1: i32) -> (i32, i32) {
    %c0_i32 = arith.constant 0 : i32
    %c0_i32_0 = arith.constant 0 : i32
    return %arg1, %c0_i32 : i32, i32
  }
  func.func @transform_3(%arg0: i32, %arg1: i32) -> (i32, i32) {
    %c0_i32 = arith.constant 0 : i32
    %c0_i32_0 = arith.constant 0 : i32
    %c0_i32_1 = arith.constant 0 : i32
    return %c0_i32, %c0_i32_0 : i32, i32
  }
  func.func @transform_4(%arg0: i32, %arg1: i32) -> (i32, i32) {
    %c0_i32 = arith.constant 0 : i32
    %c0_i32_0 = arith.constant 0 : i32
    return %arg0, %c0_i32 : i32, i32
  }
}

</mosaic_0001>

<bundles_post_ra>
// kernel: tpu_custom_call.1
= control target key start
LH: loop header
LB: loop body
LE: loop exit
PB: predicated region body
PF: predicated region fallthrough
CT: control target
= control target key end

     0   :  { %s1161_s15 = smov 0   ;;  %s1163_s16 = smov 0   ;;  %s1378_s0 = inlined_call_operand.vmem [shape: s32[1,300], index: 0, kind: input, shape index: {}]   ;;  %s1379_s1 = inlined_call_operand.vmem [shape: f32[300,8], index: 1, kind: input, shape index: {}]   ;;  %s1380_s2 = inlined_call_operand.vmem [shape: f32[300,32], index: 2, kind: input, shape index: {}]   ;;  %s1381_s3 = inlined_call_operand.vmem [shape: f32[8,32], index: 3, kind: input, shape index: {}]   ;;  %s1382_s4 = inlined_call_operand.vmem [shape: f32[40,32], index: 4, kind: output, shape index: {}]  }
   0x1   :  { %s1165_s17 = smov 0  }
   0x2 LB: > { %s23_s18 = sadd.s32 1, %s1125_s16  ;;  %p869_p0 = scmp.ge.s32.totalorder %s1129_s17, 1  ;;  %s1129_s17 = sphi %s1165_s17, %s14_s17   ;;  %s1125_s16 = sphi %s1163_s16, %s1384_s16   ;;  %s1121_s15 = sphi %s1161_s15, %s1383_s15  }
   0x3   : > { %p24_p1 = scmp.ge.s32.totalorder %s23_s18, 3  ;;  %p210_p2 = scmp.lt.s32.totalorder %s1129_s17, 4 }
   0x5   : > { %s1386_s18 = smov (%p24_p1, %s23_s18), 0  ;;  %p211_p3 = pnand %p869_p0, %p210_p2 }
   0x6   : > { %p252_p4 = scmp.lt.s32.totalorder (!%p211_p3), %s1121_s15, 2  ;;  %s870_s19 = sshll.u32 (!%p211_p3), %s1121_s15, 4 }
   0x7   : > { %214 = sbr.rel (%p211_p3) target bundleno = 504 (0x1f8), region = 36  ;;  %p260_p5 = scmp.lt.s32.totalorder (!%p211_p3), %s870_s19, 37 }
   0x8   : > { %p874_p6 = scmp.ne.s32.totalorder (!%p211_p3), %s1121_s15, 0 }
   0xe   : > { %s1184_s20 = scalar_select %p252_p4, %s1121_s15, 2 }
   0xf   : > { %s1388_s19 = smov (!%p260_p5, %s870_s19), 37  ;;  %292 = sbr.rel (%p874_p6) target bundleno = 22 (0x16), region = 40 }
  0x10   : > { %s254_s23 = scalar_lea.vmem %s1378_s0, %s1184_s20  ;;  %s871_s24 = sshll.u32 %s1388_s19, 3  ;;  %vm293_vm0 = vcmask (!%p874_p6), 261120   ;;  %v1131_v0 = vmov (!%p874_p6), 0.0  }
  0x11   : > { %s1193_s27 = scalar_lea.vmem %s1379_s1, %s871_s24  ;;  %s1198_s30 = scalar_lea.vmem %s1380_s2, %s871_s24  ;;  %294 = vst.msk [vmem:[#allocation2] sm:$0xff] (!%p874_p6), %vm293_vm0, %v1131_v0  ;;  %295 = vst.msk [vmem:[#allocation2 + $0x8] sm:$0xff] (!%p874_p6), %vm293_vm0, %v1131_v0 }
  0x12   : > { %296 = vst.msk [vmem:[#allocation2 + $0x10] sm:$0xff] (!%p874_p6), %vm293_vm0, %v1131_v0  ;;  %297 = vst.msk [vmem:[#allocation2 + $0x18] sm:$0xff] (!%p874_p6), %vm293_vm0, %v1131_v0 }
  0x13   : > { %298 = vst.msk [vmem:[#allocation2 + $0x20] sm:$0xff] (!%p874_p6), %vm293_vm0, %v1131_v0 }
  0x16 PF: > { %v366_v1 = vld [vmem:[%s1381_s3] sm:$0xff]  ;;  %vm367_vm1 = vcmask 64512   ;;  %v351_v3 = vld [vmem:[%s1193_s27 + $0x8] sm:$0xff]  ;;  %v352_v4 = vld [vmem:[%s1193_s27 + $0x10] sm:$0xff]  ;;  %v1132_v18 = vmov 0.0|0.0   ;;  %vm1133_vm2 = vmmov 0   ;;  %v300_v20 = vlaneseq }
  0x17   : > { %v350_v2 = vld [vmem:[%s1193_s27] sm:$0xff]  ;;  %957 = vmatprep.subr.mxu0 %v366_v1  ;;  %v353_v5 = vld [vmem:[%s1193_s27 + $0x18] sm:$0xff]  ;;  %v355_v7 = vld [vmem:[%s1193_s27 + $0x28] sm:$0xff]  ;;  %1062 = vmatprep.subr.bf16.mxu1 %v1132_v18  ;;  %v1134_v19 = vmov 0.0   ;;  %s875_s7 = sshll.u32 %s1121_s15, 7  ;;  %p914_p7 = scmp.ne.s32.totalorder %s1121_s15, 2 }
  0x18   : > { %959 = vmatprep.mubr.msk.f32.mxu0 %vm367_vm1, %v350_v2  ;;  %958 = vmatpush3.msra.mxu0 %v366_v1  ;;  %v354_v6 = vld [vmem:[%s1193_s27 + $0x20] sm:$0xff]  ;;  %v356_v8 = vld [vmem:[%s1193_s27 + $0x30] sm:$0xff]  ;;  %v357_v9 = vld [vmem:[%s1193_s27 + $0x38] sm:$0xff]  ;;  %v1242_v21 = vshrl.u32 %v300_v20, 7  ;;  %v1248_v23 = vstv %s875_s7 }
  0x19   : > { %960 = vmatmul.mubr.msk.f32.vlgmr.msra.gmra.mrb[0].mxu0 %vm367_vm1, %v351_v3  ;;  %v358_v10 = vld [vmem:[%s1193_s27 + $0x40] sm:$0xff]  ;;  %v359_v11 = vld [vmem:[%s1193_s27 + $0x48] sm:$0xff]  ;;  %v360_v12 = vld [vmem:[%s1193_s27 + $0x50] sm:$0xff]  ;;  %1030 = vmatprep.subr.bf16.mxu0 %v1132_v18 }
  0x1a   : > { %962 = vmatprep.mubr.msk.f32.mxu0 %vm367_vm1, %v352_v4  ;;  %v361_v13 = vld [vmem:[%s1193_s27 + $0x58] sm:$0xff]  ;;  %v362_v14 = vld [vmem:[%s1193_s27 + $0x60] sm:$0xff]  ;;  %v363_v15 = vld [vmem:[%s1193_s27 + $0x68] sm:$0xff]  ;;  %1021 = vmatprep.mubr.msk.f32.mxu1 %vm1133_vm2, %v1134_v19  ;;  %v1246_v22 = vadd.s32 8, %v1242_v21  ;;  %v318_v24 = vadd.s32 %v1248_v23, %v1242_v21  ;;  %v1255_v26 = vadd.s32 16, %v1242_v21  ;;  %v1258_v27 = vadd.s32 24, %v1242_v21 }
  0x1b   : > { %v364_v16 = vld [vmem:[%s1193_s27 + $0x70] sm:$0xff]  ;;  %v365_v17 = vld [vmem:[%s1193_s27 + $0x78] sm:$0xff]  ;;  %v562_v28 = vld [vmem:[%s1198_s30 + $0x8] sm:$0xff]  ;;  %v1263_v30 = vadd.s32 32, %v1242_v21  ;;  %v306_v31 = vadd.s32 40, %v1242_v21  ;;  %v307_v42 = vadd.s32 48, %v1242_v21 }
  0x1c   : > { %v319_v25 = vadd.s32 %v1248_v23, %v1246_v22  ;;  %v561_v29 = vld [vmem:[%s1198_s30] sm:$0xff]  ;;  %vm334_vm3 = vcmp.lt.s32.totalorder %v318_v24, 300  ;;  %v320_v33 = vadd.s32 %v1248_v23, %v1255_v26  ;;  %v321_v34 = vadd.s32 %v1248_v23, %v1258_v27  ;;  %v564_v38 = vld [vmem:[%s1198_s30 + $0x18] sm:$0xff]  ;;  %v563_v39 = vld [vmem:[%s1198_s30 + $0x10] sm:$0xff] }
  0x1d   : > { %963 = vmatmul.mubr.msk.f32.gmra.mrb[2].mxu0 %vm367_vm1, %v353_v5  ;;  %v322_v40 = vadd.s32 %v1248_v23, %v1263_v30  ;;  %v323_v41 = vadd.s32 %v1248_v23, %v306_v31  ;;  %v308_v45 = vadd.s32 56, %v1242_v21  ;;  %v566_v49 = vld [vmem:[%s1198_s30 + $0x28] sm:$0xff]  ;;  %v565_v50 = vld [vmem:[%s1198_s30 + $0x20] sm:$0xff]  ;;  %v324_v51 = vadd.s32 %v1248_v23, %v307_v42  ;;  %v568_v60 = vld [vmem:[%s1198_s30 + $0x38] sm:$0xff] }
  0x1e   : > { %965 = vmatprep.mubr.msk.f32.mxu0 %vm367_vm1, %v354_v6  ;;  %vm335_vm4 = vcmp.lt.s32.totalorder %v319_v25, 300  ;;  %vm336_vm6 = vcmp.lt.s32.totalorder %v320_v33, 300  ;;  %vm337_vm7 = vcmp.lt.s32.totalorder %v321_v34, 300  ;;  %v309_v55 = vadd.s32 64, %v1242_v21  ;;  %v567_v61 = vld [vmem:[%s1198_s30 + $0x30] sm:$0xff]  ;;  %v572_v20 = vld [vmem:[%s1198_s30 + $0x58] sm:$0xff] }
  0x1f   : > { %vm1032_vm5 = vmpackc.low %vm335_vm4, %vm334_vm3  ;;  %vm338_vm9 = vcmp.lt.s32.totalorder %v322_v40, 300  ;;  %vm339_vm10 = vcmp.lt.s32.totalorder %v323_v41, 300  ;;  %v325_v54 = vadd.s32 %v1248_v23, %v308_v45  ;;  %v310_v56 = vadd.s32 72, %v1242_v21  ;;  %v571_v24 = vld [vmem:[%s1198_s30 + $0x50] sm:$0xff] }
  0x20   : > { %vm1036_vm8 = vmpackc.low %vm337_vm7, %vm336_vm6  ;;  %vm340_vm12 = vcmp.lt.s32.totalorder %v324_v51, 300  ;;  %v311_v62 = vadd.s32 80, %v1242_v21  ;;  %v312_v63 = vadd.s32 88, %v1242_v21  ;;  %v326_v2 = vadd.s32 %v1248_v23, %v309_v55 }
  0x21   : > { %966 = vmatmul.mubr.msk.f32.gmra.mrb[4].mxu0 %vm367_vm1, %v355_v7  ;;  %vm1040_vm11 = vmpackc.low %vm339_vm10, %vm338_vm9  ;;  %vm341_vm13 = vcmp.lt.s32.totalorder %v325_v54, 300  ;;  %v327_v3 = vadd.s32 %v1248_v23, %v310_v56  ;;  %v570_v7 = vld [vmem:[%s1198_s30 + $0x48] sm:$0xff]  ;;  %v316_v33 = vadd.s32 120, %v1242_v21  ;;  %v1135_v54 = vmov 1.0  }
  0x22   : > { %968 = vmatprep.mubr.msk.f32.mxu0 %vm367_vm1, %v356_v8  ;;  %v569_v8 = vld [vmem:[%s1198_s30 + $0x40] sm:$0xff]  ;;  %vm1044_vm14 = vmpackc.low %vm341_vm13, %vm340_vm12  ;;  %vm342_vm15 = vcmp.lt.s32.totalorder %v326_v2, 300 }
  0x23   : > { %vm343_vm0 = vcmp.lt.s32.totalorder %v327_v3, 300  ;;  %v333_v42 = vadd.s32 %v1248_v23, %v316_v33 }
  0x25   : > { %969 = vmatmul.mubr.msk.f32.gmra.mrb[6].mxu0 %vm367_vm1, %v357_v9  ;;  %v328_v9 = vadd.s32 %v1248_v23, %v311_v62  ;;  %vm349_vm10 = vcmp.lt.s32.totalorder %v333_v42, 300 }
  0x26   : > { %971 = vmatprep.mubr.msk.f32.mxu0 %vm367_vm1, %v358_v10  ;;  %v329_v10 = vadd.s32 %v1248_v23, %v312_v63 }
  0x27   : > { %vm344_vm3 = vcmp.lt.s32.totalorder %v328_v9, 300 }
  0x28   : > { %vm345_vm4 = vcmp.lt.s32.totalorder %v329_v10, 300 }
  0x29   : > { %972 = vmatmul.mubr.msk.f32.gmra.mrb[8].mxu0 %vm367_vm1, %v359_v11  ;;  %v313_v11 = vadd.s32 96, %v1242_v21 }
  0x2a   : > { %974 = vmatprep.mubr.msk.f32.mxu0 %vm367_vm1, %v360_v12 }
  0x2b   : > { %v330_v25 = vadd.s32 %v1248_v23, %v313_v11 }
  0x2d   : > { %975 = vmatmul.mubr.msk.f32.gmra.mrb[10].mxu0 %vm367_vm1, %v361_v13  ;;  %vm346_vm6 = vcmp.lt.s32.totalorder %v330_v25, 300 }
  0x2e   : > { %977 = vmatprep.mubr.msk.f32.mxu0 %vm367_vm1, %v362_v14  ;;  %v314_v14 = vadd.s32 104, %v1242_v21 }
  0x30   : > { %v331_v31 = vadd.s32 %v1248_v23, %v314_v14 }
  0x31   : > { %978 = vmatmul.mubr.msk.f32.gmra.mrb[12].mxu0 %vm367_vm1, %v363_v15 }
  0x32   : > { %980 = vmatprep.mubr.msk.f32.mxu0 %vm367_vm1, %v364_v16  ;;  %vm347_vm7 = vcmp.lt.s32.totalorder %v331_v31, 300 }
  0x35   : > { %981 = vmatmul.mubr.msk.f32.gmra.mrb[14].mxu0 %vm367_vm1, %v365_v17  ;;  %vm1048_vm1 = vmpackc.low %vm343_vm0, %vm342_vm15 }
  0x36   : > { %1015 = vmatprep.mubr.msk.f32.mxu0 %vm1133_vm2, %v1134_v19 }
  0xec   : > { %v961_v32 = vpop.f32.mrb[0].mxu0 }
  0xed   : > { %v578_v35 = vmul.f32 %v961_v32, %v562_v28  ;;  %v482_v36 = vpop.f32.mrb[1].mxu0  ;;  %v315_v32 = vadd.s32 112, %v1242_v21 }
  0xee   : > { %v577_v37 = vmul.f32 %v561_v29, %v482_v36 }
  0xef   : > { %v332_v41 = vadd.s32 %v1248_v23, %v315_v32 }
  0xf0   : > { %v1031_v43 = vpack.c.bf16 %v578_v35, %v577_v37  ;;  %v964_v44 = vpop.f32.mrb[2].mxu0  ;;  %v574_v37 = vld [vmem:[%s1198_s30 + $0x68] sm:$0xff] }
  0xf1   : > { %v580_v46 = vmul.f32 %v964_v44, %v564_v38  ;;  %v492_v47 = vpop.f32.mrb[3].mxu0  ;;  %v573_v38 = vld [vmem:[%s1198_s30 + $0x60] sm:$0xff]  ;;  %vm348_vm9 = vcmp.lt.s32.totalorder %v332_v41, 300 }
  0xf2   : > { %v579_v48 = vmul.f32 %v563_v39, %v492_v47  ;;  %1033 = vmatpush3.bf16.msk.msra.mxu0 %vm1032_vm5, %v1031_v43  ;;  %1070 = vmatpush3.bf16.msk.msra.mxu1 %vm1032_vm5, %v1031_v43  ;;  %vm1052_vm5 = vmpackc.low %vm345_vm4, %vm344_vm3  ;;  %v575_v47 = vld [vmem:[%s1198_s30 + $0x70] sm:$0xff] }
  0xf3   : > { %1034 = vmatprep.subr.bf16.mxu0 %v1132_v18  ;;  %1063 = vmatprep.subr.bf16.mxu1 %v1132_v18 }
  0xf4   : > { %v1035_v52 = vpack.c.bf16 %v580_v46, %v579_v48  ;;  %v967_v53 = vpop.f32.mrb[4].mxu0  ;;  %v576_v46 = vld [vmem:[%s1198_s30 + $0x78] sm:$0xff] }
  0xf5   : > { %v582_v57 = vmul.f32 %v967_v53, %v566_v49  ;;  %v502_v58 = vpop.f32.mrb[5].mxu0 }
  0xf6   : > { %v581_v59 = vmul.f32 %v565_v50, %v502_v58  ;;  %1037 = vmatpush3.bf16.msk.msra.mxu0 %vm1036_vm8, %v1035_v52  ;;  %1071 = vmatpush3.bf16.msk.msra.mxu1 %vm1036_vm8, %v1035_v52  ;;  %vm1056_vm8 = vmpackc.low %vm347_vm7, %vm346_vm6  ;;  %v892_v52 = vld [vmem:[%s254_s23] ss:$0 sm:$0xff] }
  0xf7   : > { %1038 = vmatprep.subr.bf16.mxu0 %v1132_v18  ;;  %1064 = vmatprep.subr.bf16.mxu1 %v1132_v18  ;;  %vm655_vm12 = vcmp.eq.s32.totalorder %v1255_v26, %v892_v52  ;;  %vm653_vm13 = vcmp.eq.s32.totalorder %v1242_v21, %v892_v52  ;;  %vm654_vm15 = vcmp.eq.s32.totalorder %v1246_v22, %v892_v52  ;;  %v663_v21 = vld [vmem:[#allocation2] sm:$0xff] }
  0xf8   : > { %v1039_v0 = vpack.c.bf16 %v582_v57, %v581_v59  ;;  %v970_v1 = vpop.f32.mrb[6].mxu0  ;;  %vm657_vm0 = vcmp.eq.s32.totalorder %v1263_v30, %v892_v52  ;;  %v666_v59 = vld [vmem:[#allocation2 + $0x18] sm:$0xff] }
  0xf9   : > { %v584_v4 = vmul.f32 %v970_v1, %v568_v60  ;;  %v512_v5 = vpop.f32.mrb[7].mxu0  ;;  %v664_v60 = vld [vmem:[#allocation2 + $0x8] sm:$0xff] }
  0xfa   : > { %v583_v6 = vmul.f32 %v567_v61, %v512_v5  ;;  %1041 = vmatpush3.bf16.msk.msra.mxu0 %vm1040_vm11, %v1039_v0  ;;  %1072 = vmatpush3.bf16.msk.msra.mxu1 %vm1040_vm11, %v1039_v0  ;;  %vm1060_vm11 = vmpackc.low %vm349_vm10, %vm348_vm9  ;;  %v667_v0 = vld [vmem:[#allocation2 + $0x20] sm:$0xff] }
  0xfb   : > { %1042 = vmatprep.subr.bf16.mxu0 %v1132_v18  ;;  %1065 = vmatprep.subr.bf16.mxu1 %v1132_v18 }
  0xfc   : > { %v1043_v12 = vpack.c.bf16 %v584_v4, %v583_v6  ;;  %v973_v13 = vpop.f32.mrb[8].mxu0 }
  0xfd   : > { %v586_v15 = vmul.f32 %v973_v13, %v570_v7  ;;  %v522_v16 = vpop.f32.mrb[9].mxu0 }
  0xfe   : > { %v585_v17 = vmul.f32 %v569_v8, %v522_v16  ;;  %1045 = vmatpush3.bf16.msk.msra.mxu0 %vm1044_vm14, %v1043_v12  ;;  %1073 = vmatpush3.bf16.msk.msra.mxu1 %vm1044_vm14, %v1043_v12  ;;  %vm656_vm14 = vcmp.eq.s32.totalorder %v1258_v27, %v892_v52 }
  0xff   : > { %1046 = vmatprep.subr.bf16.mxu0 %v1132_v18  ;;  %1066 = vmatprep.subr.bf16.mxu1 %v1132_v18 }
 0x100   : > { %v1047_v28 = vpack.c.bf16 %v586_v15, %v585_v17  ;;  %v976_v29 = vpop.f32.mrb[10].mxu0 }
 0x101   : > { %v588_v34 = vmul.f32 %v976_v29, %v572_v20  ;;  %v532_v35 = vpop.f32.mrb[11].mxu0 }
 0x102   : > { %v587_v36 = vmul.f32 %v571_v24, %v532_v35  ;;  %1049 = vmatpush3.bf16.msk.msra.mxu0 %vm1048_vm1, %v1047_v28  ;;  %1074 = vmatpush3.bf16.msk.msra.mxu1 %vm1048_vm1, %v1047_v28  ;;  %vm763_vm1 = vcmask 261120  }
 0x103   : > { %1050 = vmatprep.subr.bf16.mxu0 %v1132_v18  ;;  %1067 = vmatprep.subr.bf16.mxu1 %v1132_v18 }
 0x104   : > { %v1051_v39 = vpack.c.bf16 %v588_v34, %v587_v36  ;;  %v979_v40 = vpop.f32.mrb[12].mxu0 }
 0x105   : > { %v590_v43 = vmul.f32 %v979_v40, %v574_v37  ;;  %v542_v44 = vpop.f32.mrb[13].mxu0 }
 0x106   : > { %v589_v45 = vmul.f32 %v573_v38, %v542_v44  ;;  %1053 = vmatpush3.bf16.msk.msra.mxu0 %vm1052_vm5, %v1051_v39  ;;  %1075 = vmatpush3.bf16.msk.msra.mxu1 %vm1052_vm5, %v1051_v39 }
 0x107   : > { %1054 = vmatprep.subr.bf16.mxu0 %v1132_v18  ;;  %1068 = vmatprep.subr.bf16.mxu1 %v1132_v18 }
 0x108   : > { %v1055_v48 = vpack.c.bf16 %v590_v43, %v589_v45  ;;  %v982_v49 = vpop.f32.mrb[14].mxu0 }
 0x109   : > { %v592_v50 = vmul.f32 %v982_v49, %v576_v46  ;;  %v552_v23 = vpop.f32.mrb[15].mxu0 }
 0x10a   : > { %v591_v51 = vmul.f32 %v575_v47, %v552_v23  ;;  %1057 = vmatpush3.bf16.msk.msra.mxu0 %vm1056_vm8, %v1055_v48  ;;  %1076 = vmatpush3.bf16.msk.msra.mxu1 %vm1056_vm8, %v1055_v48 }
 0x10b   : > { %1058 = vmatprep.subr.bf16.mxu0 %v1132_v18  ;;  %1069 = vmatprep.subr.bf16.mxu1 %v1132_v18  ;;  %v665_v18 = vld [vmem:[#allocation2 + $0x10] sm:$0xff] }
 0x10c   : > { %v1059_v53 = vpack.c.bf16 %v592_v50, %v591_v51 }
 0x10e   : > { %1061 = vmatpush3.bf16.msk.msra.mxu0 %vm1060_vm11, %v1059_v53  ;;  %1077 = vmatpush3.bf16.msk.msra.mxu1 %vm1060_vm11, %v1059_v53 }
 0x111   : > { %1022 = vmatmul.mubr.msk.f32.vlgmr.msra.gmra.mrb[0].mxu1 %vm655_vm12, %v1135_v54  ;;  %1016 = vmatmul.mubr.msk.f32.vlgmr.msra.gmra.mrb[16].mxu0 %vm653_vm13, %v1135_v54 }
 0x112   : > { %1024 = vmatprep.mubr.msk.f32.mxu1 %vm1133_vm2, %v1134_v19  ;;  %1018 = vmatprep.mubr.msk.f32.mxu0 %vm1133_vm2, %v1134_v19 }
 0x115   : > { %1025 = vmatmul.mubr.msk.f32.gmra.mrb[2].mxu1 %vm656_vm14, %v1135_v54  ;;  %1019 = vmatmul.mubr.msk.f32.gmra.mrb[18].mxu0 %vm654_vm15, %v1135_v54 }
 0x116   : > { %1027 = vmatprep.mubr.msk.f32.mxu1 %vm1133_vm2, %v1134_v19 }
 0x119   : > { %1028 = vmatmul.mubr.msk.f32.gmra.mrb[4].mxu1 %vm657_vm0, %v1135_v54 }
 0x1e4   : > { %v744_v26 = vpop.f32.mrb[0].mxu1  ;;  %v734_v55 = vpop.f32.mrb[16].mxu0 }
 0x1e5   : > { %v760_v56 = vadd.f32 %v744_v26, %v665_v18  ;;  %v1023_v27 = vpop.f32.mrb[1].mxu1  ;;  %v758_v57 = vadd.f32 %v734_v55, %v663_v21  ;;  %v1017_v58 = vpop.f32.mrb[17].mxu0 }
 0x1e7   : > { %766 = vst.msk [vmem:[#allocation2 + $0x10] sm:$0xff] %vm763_vm1, %v760_v56  ;;  %764 = vst.msk [vmem:[#allocation2] sm:$0xff] %vm763_vm1, %v758_v57 }
 0x1e8   : > { %v749_v22 = vpop.f32.mrb[2].mxu1  ;;  %v739_v19 = vpop.f32.mrb[18].mxu0 }
 0x1e9   : > { %v761_v61 = vadd.f32 %v749_v22, %v666_v59  ;;  %v1026_v30 = vpop.f32.mrb[3].mxu1  ;;  %v759_v62 = vadd.f32 %v739_v19, %v664_v60  ;;  %v1020_v63 = vpop.f32.mrb[19].mxu0  ;;  %772 = sbr.rel (%p914_p7) target bundleno = 504 (0x1f8), region = 44 }
 0x1eb   : > { %767 = vst.msk [vmem:[#allocation2 + $0x18] sm:$0xff] %vm763_vm1, %v761_v61  ;;  %765 = vst.msk [vmem:[#allocation2 + $0x8] sm:$0xff] %vm763_vm1, %v759_v62 }
 0x1ec   : > { %v754_v1 = vpop.f32.mrb[4].mxu1 }
 0x1ed   : > { %v762_v2 = vadd.f32 %v754_v1, %v667_v0  ;;  %v1029_v3 = vpop.f32.mrb[5].mxu1 }
 0x1ee   : > { %v773_v4 = vld [vmem:[#allocation2] sm:$0xff] (!%p914_p7)  ;;  %v775_v6 = vld [vmem:[#allocation2 + $0x10] sm:$0xff] (!%p914_p7) }
 0x1ef   : > { %768 = vst.msk [vmem:[#allocation2 + $0x20] sm:$0xff] %vm763_vm1, %v762_v2  ;;  %778 = vst.msk [vmem:[%s1382_s4] sm:$0xff] (!%p914_p7), %vm763_vm1, %v773_v4 }
 0x1f0   : > { %780 = vst.msk [vmem:[%s1382_s4 + $0x10] sm:$0xff] %vm763_vm1, %v775_v6 }
 0x1f2   : > { %v774_v5 = vld [vmem:[#allocation2 + $0x8] sm:$0xff]  ;;  %v776_v7 = vld [vmem:[#allocation2 + $0x18] sm:$0xff] }
 0x1f3   : > { %779 = vst.msk [vmem:[%s1382_s4 + $0x8] sm:$0xff] %vm763_vm1, %v774_v5  ;;  %781 = vst.msk [vmem:[%s1382_s4 + $0x18] sm:$0xff] %vm763_vm1, %v776_v7 }
 0x1f6   : > { %v777_v8 = vld [vmem:[#allocation2 + $0x20] sm:$0xff] }
 0x1f7   : > { %782 = vst.msk [vmem:[%s1382_s4 + $0x20] sm:$0xff] %vm763_vm1, %v777_v8 }
 0x1f8 PF: > { %s14_s17 = sadd.s32 1, %s1129_s17   ;;  %s1383_s15 = smov %s1125_s16 }
 0x1f9   : > { %p11_p8 = scmp.ge.s32.totalorder %s14_s17, 5   ;;  %s1384_s16 = smov %s1386_s18 }
 0x1fb   :  { %13 = sbr.rel (!%p11_p8) target bundleno = 2 (0x2), region = 80 }

// kernel: tpu_custom_call.1
= control target key start
LH: loop header
LB: loop body
LE: loop exit
PB: predicated region body
PF: predicated region fallthrough
CT: control target
= control target key end

     0   :  { %s1161_s15 = smov 0   ;;  %s1163_s16 = smov 0   ;;  %s1378_s0 = inlined_call_operand.vmem [shape: s32[1,300], index: 0, kind: input, shape index: {}]   ;;  %s1379_s1 = inlined_call_operand.vmem [shape: f32[300,8], index: 1, kind: input, shape index: {}]   ;;  %s1380_s2 = inlined_call_operand.vmem [shape: f32[300,32], index: 2, kind: input, shape index: {}]   ;;  %s1381_s3 = inlined_call_operand.vmem [shape: f32[8,32], index: 3, kind: input, shape index: {}]   ;;  %s1382_s4 = inlined_call_operand.vmem [shape: f32[40,32], index: 4, kind: output, shape index: {}]  }
   0x1   :  { %s1165_s17 = smov 0  }
   0x2 LB: > { %s23_s18 = sadd.s32 1, %s1125_s16  ;;  %p869_p0 = scmp.ge.s32.totalorder %s1129_s17, 1  ;;  %s1129_s17 = sphi %s1165_s17, %s14_s17   ;;  %s1125_s16 = sphi %s1163_s16, %s1384_s16   ;;  %s1121_s15 = sphi %s1161_s15, %s1383_s15  }
   0x3   : > { %p24_p1 = scmp.ge.s32.totalorder %s23_s18, 3  ;;  %p210_p2 = scmp.lt.s32.totalorder %s1129_s17, 4 }
   0x5   : > { %s1386_s18 = smov (%p24_p1, %s23_s18), 0  ;;  %p211_p3 = pnand %p869_p0, %p210_p2 }
   0x6   : > { %p252_p4 = scmp.lt.s32.totalorder (!%p211_p3), %s1121_s15, 2  ;;  %s870_s19 = sshll.u32 (!%p211_p3), %s1121_s15, 4 }
   0x7   : > { %214 = sbr.rel (%p211_p3) target bundleno = 504 (0x1f8), region = 36  ;;  %p260_p5 = scmp.lt.s32.totalorder (!%p211_p3), %s870_s19, 37 }
   0x8   : > { %p874_p6 = scmp.ne.s32.totalorder (!%p211_p3), %s1121_s15, 0 }
   0xe   : > { %s1184_s20 = scalar_select %p252_p4, %s1121_s15, 2 }
   0xf   : > { %s1388_s19 = smov (!%p260_p5, %s870_s19), 37  ;;  %292 = sbr.rel (%p874_p6) target bundleno = 22 (0x16), region = 40 }
  0x10   : > { %s254_s23 = scalar_lea.vmem %s1378_s0, %s1184_s20  ;;  %s871_s24 = sshll.u32 %s1388_s19, 3  ;;  %vm293_vm0 = vcmask (!%p874_p6), 261120   ;;  %v1131_v0 = vmov (!%p874_p6), 0.0  }
  0x11   : > { %s1193_s27 = scalar_lea.vmem %s1379_s1, %s871_s24  ;;  %s1198_s30 = scalar_lea.vmem %s1380_s2, %s871_s24  ;;  %294 = vst.msk [vmem:[#allocation2] sm:$0xff] (!%p874_p6), %vm293_vm0, %v1131_v0  ;;  %295 = vst.msk [vmem:[#allocation2 + $0x8] sm:$0xff] (!%p874_p6), %vm293_vm0, %v1131_v0 }
  0x12   : > { %296 = vst.msk [vmem:[#allocation2 + $0x10] sm:$0xff] (!%p874_p6), %vm293_vm0, %v1131_v0  ;;  %297 = vst.msk [vmem:[#allocation2 + $0x18] sm:$0xff] (!%p874_p6), %vm293_vm0, %v1131_v0 }
  0x13   : > { %298 = vst.msk [vmem:[#allocation2 + $0x20] sm:$0xff] (!%p874_p6), %vm293_vm0, %v1131_v0 }
  0x16 PF: > { %v366_v1 = vld [vmem:[%s1381_s3] sm:$0xff]  ;;  %vm367_vm1 = vcmask 64512   ;;  %v351_v3 = vld [vmem:[%s1193_s27 + $0x8] sm:$0xff]  ;;  %v352_v4 = vld [vmem:[%s1193_s27 + $0x10] sm:$0xff]  ;;  %v1132_v18 = vmov 0.0|0.0   ;;  %vm1133_vm2 = vmmov 0   ;;  %v300_v20 = vlaneseq }
  0x17   : > { %v350_v2 = vld [vmem:[%s1193_s27] sm:$0xff]  ;;  %957 = vmatprep.subr.mxu0 %v366_v1  ;;  %v353_v5 = vld [vmem:[%s1193_s27 + $0x18] sm:$0xff]  ;;  %v355_v7 = vld [vmem:[%s1193_s27 + $0x28] sm:$0xff]  ;;  %1062 = vmatprep.subr.bf16.mxu1 %v1132_v18  ;;  %v1134_v19 = vmov 0.0   ;;  %s875_s7 = sshll.u32 %s1121_s15, 7  ;;  %p914_p7 = scmp.ne.s32.totalorder %s1121_s15, 2 }
  0x18   : > { %959 = vmatprep.mubr.msk.f32.mxu0 %vm367_vm1, %v350_v2  ;;  %958 = vmatpush3.msra.mxu0 %v366_v1  ;;  %v354_v6 = vld [vmem:[%s1193_s27 + $0x20] sm:$0xff]  ;;  %v356_v8 = vld [vmem:[%s1193_s27 + $0x30] sm:$0xff]  ;;  %v357_v9 = vld [vmem:[%s1193_s27 + $0x38] sm:$0xff]  ;;  %v1242_v21 = vshrl.u32 %v300_v20, 7  ;;  %v1248_v23 = vstv %s875_s7 }
  0x19   : > { %960 = vmatmul.mubr.msk.f32.vlgmr.msra.gmra.mrb[0].mxu0 %vm367_vm1, %v351_v3  ;;  %v358_v10 = vld [vmem:[%s1193_s27 + $0x40] sm:$0xff]  ;;  %v359_v11 = vld [vmem:[%s1193_s27 + $0x48] sm:$0xff]  ;;  %v360_v12 = vld [vmem:[%s1193_s27 + $0x50] sm:$0xff]  ;;  %1030 = vmatprep.subr.bf16.mxu0 %v1132_v18 }
  0x1a   : > { %962 = vmatprep.mubr.msk.f32.mxu0 %vm367_vm1, %v352_v4  ;;  %v361_v13 = vld [vmem:[%s1193_s27 + $0x58] sm:$0xff]  ;;  %v362_v14 = vld [vmem:[%s1193_s27 + $0x60] sm:$0xff]  ;;  %v363_v15 = vld [vmem:[%s1193_s27 + $0x68] sm:$0xff]  ;;  %1021 = vmatprep.mubr.msk.f32.mxu1 %vm1133_vm2, %v1134_v19  ;;  %v1246_v22 = vadd.s32 8, %v1242_v21  ;;  %v318_v24 = vadd.s32 %v1248_v23, %v1242_v21  ;;  %v1255_v26 = vadd.s32 16, %v1242_v21  ;;  %v1258_v27 = vadd.s32 24, %v1242_v21 }
  0x1b   : > { %v364_v16 = vld [vmem:[%s1193_s27 + $0x70] sm:$0xff]  ;;  %v365_v17 = vld [vmem:[%s1193_s27 + $0x78] sm:$0xff]  ;;  %v562_v28 = vld [vmem:[%s1198_s30 + $0x8] sm:$0xff]  ;;  %v1263_v30 = vadd.s32 32, %v1242_v21  ;;  %v306_v31 = vadd.s32 40, %v1242_v21  ;;  %v307_v42 = vadd.s32 48, %v1242_v21 }
  0x1c   : > { %v319_v25 = vadd.s32 %v1248_v23, %v1246_v22  ;;  %v561_v29 = vld [vmem:[%s1198_s30] sm:$0xff]  ;;  %vm334_vm3 = vcmp.lt.s32.totalorder %v318_v24, 300  ;;  %v320_v33 = vadd.s32 %v1248_v23, %v1255_v26  ;;  %v321_v34 = vadd.s32 %v1248_v23, %v1258_v27  ;;  %v564_v38 = vld [vmem:[%s1198_s30 + $0x18] sm:$0xff]  ;;  %v563_v39 = vld [vmem:[%s1198_s30 + $0x10] sm:$0xff] }
  0x1d   : > { %963 = vmatmul.mubr.msk.f32.gmra.mrb[2].mxu0 %vm367_vm1, %v353_v5  ;;  %v322_v40 = vadd.s32 %v1248_v23, %v1263_v30  ;;  %v323_v41 = vadd.s32 %v1248_v23, %v306_v31  ;;  %v308_v45 = vadd.s32 56, %v1242_v21  ;;  %v566_v49 = vld [vmem:[%s1198_s30 + $0x28] sm:$0xff]  ;;  %v565_v50 = vld [vmem:[%s1198_s30 + $0x20] sm:$0xff]  ;;  %v324_v51 = vadd.s32 %v1248_v23, %v307_v42  ;;  %v568_v60 = vld [vmem:[%s1198_s30 + $0x38] sm:$0xff] }
  0x1e   : > { %965 = vmatprep.mubr.msk.f32.mxu0 %vm367_vm1, %v354_v6  ;;  %vm335_vm4 = vcmp.lt.s32.totalorder %v319_v25, 300  ;;  %vm336_vm6 = vcmp.lt.s32.totalorder %v320_v33, 300  ;;  %vm337_vm7 = vcmp.lt.s32.totalorder %v321_v34, 300  ;;  %v309_v55 = vadd.s32 64, %v1242_v21  ;;  %v567_v61 = vld [vmem:[%s1198_s30 + $0x30] sm:$0xff]  ;;  %v572_v20 = vld [vmem:[%s1198_s30 + $0x58] sm:$0xff] }
  0x1f   : > { %vm1032_vm5 = vmpackc.low %vm335_vm4, %vm334_vm3  ;;  %vm338_vm9 = vcmp.lt.s32.totalorder %v322_v40, 300  ;;  %vm339_vm10 = vcmp.lt.s32.totalorder %v323_v41, 300  ;;  %v325_v54 = vadd.s32 %v1248_v23, %v308_v45  ;;  %v310_v56 = vadd.s32 72, %v1242_v21  ;;  %v571_v24 = vld [vmem:[%s1198_s30 + $0x50] sm:$0xff] }
  0x20   : > { %vm1036_vm8 = vmpackc.low %vm337_vm7, %vm336_vm6  ;;  %vm340_vm12 = vcmp.lt.s32.totalorder %v324_v51, 300  ;;  %v311_v62 = vadd.s32 80, %v1242_v21  ;;  %v312_v63 = vadd.s32 88, %v1242_v21  ;;  %v326_v2 = vadd.s32 %v1248_v23, %v309_v55 }
  0x21   : > { %966 = vmatmul.mubr.msk.f32.gmra.mrb[4].mxu0 %vm367_vm1, %v355_v7  ;;  %vm1040_vm11 = vmpackc.low %vm339_vm10, %vm338_vm9  ;;  %vm341_vm13 = vcmp.lt.s32.totalorder %v325_v54, 300  ;;  %v327_v3 = vadd.s32 %v1248_v23, %v310_v56  ;;  %v570_v7 = vld [vmem:[%s1198_s30 + $0x48] sm:$0xff]  ;;  %v316_v33 = vadd.s32 120, %v1242_v21  ;;  %v1135_v54 = vmov 1.0  }
  0x22   : > { %968 = vmatprep.mubr.msk.f32.mxu0 %vm367_vm1, %v356_v8  ;;  %v569_v8 = vld [vmem:[%s1198_s30 + $0x40] sm:$0xff]  ;;  %vm1044_vm14 = vmpackc.low %vm341_vm13, %vm340_vm12  ;;  %vm342_vm15 = vcmp.lt.s32.totalorder %v326_v2, 300 }
  0x23   : > { %vm343_vm0 = vcmp.lt.s32.totalorder %v327_v3, 300  ;;  %v333_v42 = vadd.s32 %v1248_v23, %v316_v33 }
  0x25   : > { %969 = vmatmul.mubr.msk.f32.gmra.mrb[6].mxu0 %vm367_vm1, %v357_v9  ;;  %v328_v9 = vadd.s32 %v1248_v23, %v311_v62  ;;  %vm349_vm10 = vcmp.lt.s32.totalorder %v333_v42, 300 }
  0x26   : > { %971 = vmatprep.mubr.msk.f32.mxu0 %vm367_vm1, %v358_v10  ;;  %v329_v10 = vadd.s32 %v1248_v23, %v312_v63 }
  0x27   : > { %vm344_vm3 = vcmp.lt.s32.totalorder %v328_v9, 300 }
  0x28   : > { %vm345_vm4 = vcmp.lt.s32.totalorder %v329_v10, 300 }
  0x29   : > { %972 = vmatmul.mubr.msk.f32.gmra.mrb[8].mxu0 %vm367_vm1, %v359_v11  ;;  %v313_v11 = vadd.s32 96, %v1242_v21 }
  0x2a   : > { %974 = vmatprep.mubr.msk.f32.mxu0 %vm367_vm1, %v360_v12 }
  0x2b   : > { %v330_v25 = vadd.s32 %v1248_v23, %v313_v11 }
  0x2d   : > { %975 = vmatmul.mubr.msk.f32.gmra.mrb[10].mxu0 %vm367_vm1, %v361_v13  ;;  %vm346_vm6 = vcmp.lt.s32.totalorder %v330_v25, 300 }
  0x2e   : > { %977 = vmatprep.mubr.msk.f32.mxu0 %vm367_vm1, %v362_v14  ;;  %v314_v14 = vadd.s32 104, %v1242_v21 }
  0x30   : > { %v331_v31 = vadd.s32 %v1248_v23, %v314_v14 }
  0x31   : > { %978 = vmatmul.mubr.msk.f32.gmra.mrb[12].mxu0 %vm367_vm1, %v363_v15 }
  0x32   : > { %980 = vmatprep.mubr.msk.f32.mxu0 %vm367_vm1, %v364_v16  ;;  %vm347_vm7 = vcmp.lt.s32.totalorder %v331_v31, 300 }
  0x35   : > { %981 = vmatmul.mubr.msk.f32.gmra.mrb[14].mxu0 %vm367_vm1, %v365_v17  ;;  %vm1048_vm1 = vmpackc.low %vm343_vm0, %vm342_vm15 }
  0x36   : > { %1015 = vmatprep.mubr.msk.f32.mxu0 %vm1133_vm2, %v1134_v19 }
  0xec   : > { %v961_v32 = vpop.f32.mrb[0].mxu0 }
  0xed   : > { %v578_v35 = vmul.f32 %v961_v32, %v562_v28  ;;  %v482_v36 = vpop.f32.mrb[1].mxu0  ;;  %v315_v32 = vadd.s32 112, %v1242_v21 }
  0xee   : > { %v577_v37 = vmul.f32 %v561_v29, %v482_v36 }
  0xef   : > { %v332_v41 = vadd.s32 %v1248_v23, %v315_v32 }
  0xf0   : > { %v1031_v43 = vpack.c.bf16 %v578_v35, %v577_v37  ;;  %v964_v44 = vpop.f32.mrb[2].mxu0  ;;  %v574_v37 = vld [vmem:[%s1198_s30 + $0x68] sm:$0xff] }
  0xf1   : > { %v580_v46 = vmul.f32 %v964_v44, %v564_v38  ;;  %v492_v47 = vpop.f32.mrb[3].mxu0  ;;  %v573_v38 = vld [vmem:[%s1198_s30 + $0x60] sm:$0xff]  ;;  %vm348_vm9 = vcmp.lt.s32.totalorder %v332_v41, 300 }
  0xf2   : > { %v579_v48 = vmul.f32 %v563_v39, %v492_v47  ;;  %1033 = vmatpush3.bf16.msk.msra.mxu0 %vm1032_vm5, %v1031_v43  ;;  %1070 = vmatpush3.bf16.msk.msra.mxu1 %vm1032_vm5, %v1031_v43  ;;  %vm1052_vm5 = vmpackc.low %vm345_vm4, %vm344_vm3  ;;  %v575_v47 = vld [vmem:[%s1198_s30 + $0x70] sm:$0xff] }
  0xf3   : > { %1034 = vmatprep.subr.bf16.mxu0 %v1132_v18  ;;  %1063 = vmatprep.subr.bf16.mxu1 %v1132_v18 }
  0xf4   : > { %v1035_v52 = vpack.c.bf16 %v580_v46, %v579_v48  ;;  %v967_v53 = vpop.f32.mrb[4].mxu0  ;;  %v576_v46 = vld [vmem:[%s1198_s30 + $0x78] sm:$0xff] }
  0xf5   : > { %v582_v57 = vmul.f32 %v967_v53, %v566_v49  ;;  %v502_v58 = vpop.f32.mrb[5].mxu0 }
  0xf6   : > { %v581_v59 = vmul.f32 %v565_v50, %v502_v58  ;;  %1037 = vmatpush3.bf16.msk.msra.mxu0 %vm1036_vm8, %v1035_v52  ;;  %1071 = vmatpush3.bf16.msk.msra.mxu1 %vm1036_vm8, %v1035_v52  ;;  %vm1056_vm8 = vmpackc.low %vm347_vm7, %vm346_vm6  ;;  %v892_v52 = vld [vmem:[%s254_s23] ss:$0 sm:$0xff] }
  0xf7   : > { %1038 = vmatprep.subr.bf16.mxu0 %v1132_v18  ;;  %1064 = vmatprep.subr.bf16.mxu1 %v1132_v18  ;;  %vm655_vm12 = vcmp.eq.s32.totalorder %v1255_v26, %v892_v52  ;;  %vm653_vm13 = vcmp.eq.s32.totalorder %v1242_v21, %v892_v52  ;;  %vm654_vm15 = vcmp.eq.s32.totalorder %v1246_v22, %v892_v52  ;;  %v663_v21 = vld [vmem:[#allocation2] sm:$0xff] }
  0xf8   : > { %v1039_v0 = vpack.c.bf16 %v582_v57, %v581_v59  ;;  %v970_v1 = vpop.f32.mrb[6].mxu0  ;;  %vm657_vm0 = vcmp.eq.s32.totalorder %v1263_v30, %v892_v52  ;;  %v666_v59 = vld [vmem:[#allocation2 + $0x18] sm:$0xff] }
  0xf9   : > { %v584_v4 = vmul.f32 %v970_v1, %v568_v60  ;;  %v512_v5 = vpop.f32.mrb[7].mxu0  ;;  %v664_v60 = vld [vmem:[#allocation2 + $0x8] sm:$0xff] }
  0xfa   : > { %v583_v6 = vmul.f32 %v567_v61, %v512_v5  ;;  %1041 = vmatpush3.bf16.msk.msra.mxu0 %vm1040_vm11, %v1039_v0  ;;  %1072 = vmatpush3.bf16.msk.msra.mxu1 %vm1040_vm11, %v1039_v0  ;;  %vm1060_vm11 = vmpackc.low %vm349_vm10, %vm348_vm9  ;;  %v667_v0 = vld [vmem:[#allocation2 + $0x20] sm:$0xff] }
  0xfb   : > { %1042 = vmatprep.subr.bf16.mxu0 %v1132_v18  ;;  %1065 = vmatprep.subr.bf16.mxu1 %v1132_v18 }
  0xfc   : > { %v1043_v12 = vpack.c.bf16 %v584_v4, %v583_v6  ;;  %v973_v13 = vpop.f32.mrb[8].mxu0 }
  0xfd   : > { %v586_v15 = vmul.f32 %v973_v13, %v570_v7  ;;  %v522_v16 = vpop.f32.mrb[9].mxu0 }
  0xfe   : > { %v585_v17 = vmul.f32 %v569_v8, %v522_v16  ;;  %1045 = vmatpush3.bf16.msk.msra.mxu0 %vm1044_vm14, %v1043_v12  ;;  %1073 = vmatpush3.bf16.msk.msra.mxu1 %vm1044_vm14, %v1043_v12  ;;  %vm656_vm14 = vcmp.eq.s32.totalorder %v1258_v27, %v892_v52 }
  0xff   : > { %1046 = vmatprep.subr.bf16.mxu0 %v1132_v18  ;;  %1066 = vmatprep.subr.bf16.mxu1 %v1132_v18 }
 0x100   : > { %v1047_v28 = vpack.c.bf16 %v586_v15, %v585_v17  ;;  %v976_v29 = vpop.f32.mrb[10].mxu0 }
 0x101   : > { %v588_v34 = vmul.f32 %v976_v29, %v572_v20  ;;  %v532_v35 = vpop.f32.mrb[11].mxu0 }
 0x102   : > { %v587_v36 = vmul.f32 %v571_v24, %v532_v35  ;;  %1049 = vmatpush3.bf16.msk.msra.mxu0 %vm1048_vm1, %v1047_v28  ;;  %1074 = vmatpush3.bf16.msk.msra.mxu1 %vm1048_vm1, %v1047_v28  ;;  %vm763_vm1 = vcmask 261120  }
 0x103   : > { %1050 = vmatprep.subr.bf16.mxu0 %v1132_v18  ;;  %1067 = vmatprep.subr.bf16.mxu1 %v1132_v18 }
 0x104   : > { %v1051_v39 = vpack.c.bf16 %v588_v34, %v587_v36  ;;  %v979_v40 = vpop.f32.mrb[12].mxu0 }
 0x105   : > { %v590_v43 = vmul.f32 %v979_v40, %v574_v37  ;;  %v542_v44 = vpop.f32.mrb[13].mxu0 }
 0x106   : > { %v589_v45 = vmul.f32 %v573_v38, %v542_v44  ;;  %1053 = vmatpush3.bf16.msk.msra.mxu0 %vm1052_vm5, %v1051_v39  ;;  %1075 = vmatpush3.bf16.msk.msra.mxu1 %vm1052_vm5, %v1051_v39 }
 0x107   : > { %1054 = vmatprep.subr.bf16.mxu0 %v1132_v18  ;;  %1068 = vmatprep.subr.bf16.mxu1 %v1132_v18 }
 0x108   : > { %v1055_v48 = vpack.c.bf16 %v590_v43, %v589_v45  ;;  %v982_v49 = vpop.f32.mrb[14].mxu0 }
 0x109   : > { %v592_v50 = vmul.f32 %v982_v49, %v576_v46  ;;  %v552_v23 = vpop.f32.mrb[15].mxu0 }
 0x10a   : > { %v591_v51 = vmul.f32 %v575_v47, %v552_v23  ;;  %1057 = vmatpush3.bf16.msk.msra.mxu0 %vm1056_vm8, %v1055_v48  ;;  %1076 = vmatpush3.bf16.msk.msra.mxu1 %vm1056_vm8, %v1055_v48 }
 0x10b   : > { %1058 = vmatprep.subr.bf16.mxu0 %v1132_v18  ;;  %1069 = vmatprep.subr.bf16.mxu1 %v1132_v18  ;;  %v665_v18 = vld [vmem:[#allocation2 + $0x10] sm:$0xff] }
 0x10c   : > { %v1059_v53 = vpack.c.bf16 %v592_v50, %v591_v51 }
 0x10e   : > { %1061 = vmatpush3.bf16.msk.msra.mxu0 %vm1060_vm11, %v1059_v53  ;;  %1077 = vmatpush3.bf16.msk.msra.mxu1 %vm1060_vm11, %v1059_v53 }
 0x111   : > { %1022 = vmatmul.mubr.msk.f32.vlgmr.msra.gmra.mrb[0].mxu1 %vm655_vm12, %v1135_v54  ;;  %1016 = vmatmul.mubr.msk.f32.vlgmr.msra.gmra.mrb[16].mxu0 %vm653_vm13, %v1135_v54 }
 0x112   : > { %1024 = vmatprep.mubr.msk.f32.mxu1 %vm1133_vm2, %v1134_v19  ;;  %1018 = vmatprep.mubr.msk.f32.mxu0 %vm1133_vm2, %v1134_v19 }
 0x115   : > { %1025 = vmatmul.mubr.msk.f32.gmra.mrb[2].mxu1 %vm656_vm14, %v1135_v54  ;;  %1019 = vmatmul.mubr.msk.f32.gmra.mrb[18].mxu0 %vm654_vm15, %v1135_v54 }
 0x116   : > { %1027 = vmatprep.mubr.msk.f32.mxu1 %vm1133_vm2, %v1134_v19 }
 0x119   : > { %1028 = vmatmul.mubr.msk.f32.gmra.mrb[4].mxu1 %vm657_vm0, %v1135_v54 }
 0x1e4   : > { %v744_v26 = vpop.f32.mrb[0].mxu1  ;;  %v734_v55 = vpop.f32.mrb[16].mxu0 }
 0x1e5   : > { %v760_v56 = vadd.f32 %v744_v26, %v665_v18  ;;  %v1023_v27 = vpop.f32.mrb[1].mxu1  ;;  %v758_v57 = vadd.f32 %v734_v55, %v663_v21  ;;  %v1017_v58 = vpop.f32.mrb[17].mxu0 }
 0x1e7   : > { %766 = vst.msk [vmem:[#allocation2 + $0x10] sm:$0xff] %vm763_vm1, %v760_v56  ;;  %764 = vst.msk [vmem:[#allocation2] sm:$0xff] %vm763_vm1, %v758_v57 }
 0x1e8   : > { %v749_v22 = vpop.f32.mrb[2].mxu1  ;;  %v739_v19 = vpop.f32.mrb[18].mxu0 }
 0x1e9   : > { %v761_v61 = vadd.f32 %v749_v22, %v666_v59  ;;  %v1026_v30 = vpop.f32.mrb[3].mxu1  ;;  %v759_v62 = vadd.f32 %v739_v19, %v664_v60  ;;  %v1020_v63 = vpop.f32.mrb[19].mxu0  ;;  %772 = sbr.rel (%p914_p7) target bundleno = 504 (0x1f8), region = 44 }
 0x1eb   : > { %767 = vst.msk [vmem:[#allocation2 + $0x18] sm:$0xff] %vm763_vm1, %v761_v61  ;;  %765 = vst.msk [vmem:[#allocation2 + $0x8] sm:$0xff] %vm763_vm1, %v759_v62 }
 0x1ec   : > { %v754_v1 = vpop.f32.mrb[4].mxu1 }
 0x1ed   : > { %v762_v2 = vadd.f32 %v754_v1, %v667_v0  ;;  %v1029_v3 = vpop.f32.mrb[5].mxu1 }
 0x1ee   : > { %v773_v4 = vld [vmem:[#allocation2] sm:$0xff] (!%p914_p7)  ;;  %v775_v6 = vld [vmem:[#allocation2 + $0x10] sm:$0xff] (!%p914_p7) }
 0x1ef   : > { %768 = vst.msk [vmem:[#allocation2 + $0x20] sm:$0xff] %vm763_vm1, %v762_v2  ;;  %778 = vst.msk [vmem:[%s1382_s4] sm:$0xff] (!%p914_p7), %vm763_vm1, %v773_v4 }
 0x1f0   : > { %780 = vst.msk [vmem:[%s1382_s4 + $0x10] sm:$0xff] %vm763_vm1, %v775_v6 }
 0x1f2   : > { %v774_v5 = vld [vmem:[#allocation2 + $0x8] sm:$0xff]  ;;  %v776_v7 = vld [vmem:[#allocation2 + $0x18] sm:$0xff] }
 0x1f3   : > { %779 = vst.msk [vmem:[%s1382_s4 + $0x8] sm:$0xff] %vm763_vm1, %v774_v5  ;;  %781 = vst.msk [vmem:[%s1382_s4 + $0x18] sm:$0xff] %vm763_vm1, %v776_v7 }
 0x1f6   : > { %v777_v8 = vld [vmem:[#allocation2 + $0x20] sm:$0xff] }
 0x1f7   : > { %782 = vst.msk [vmem:[%s1382_s4 + $0x20] sm:$0xff] %vm763_vm1, %v777_v8 }
 0x1f8 PF: > { %s14_s17 = sadd.s32 1, %s1129_s17   ;;  %s1383_s15 = smov %s1125_s16 }
 0x1f9   : > { %p11_p8 = scmp.ge.s32.totalorder %s14_s17, 5   ;;  %s1384_s16 = smov %s1386_s18 }
 0x1fb   :  { %13 = sbr.rel (!%p11_p8) target bundleno = 2 (0x2), region = 80 }

</bundles_post_ra>
